<compile_context>
chip_gen: v6e
topology: v6e:2x2x1
jax: 0.10.0
libtpu: 0.0.40
codegen_flags: <defaults>
</compile_context>

<pallas_src>
import jax
import jax.numpy as jnp
from jax.experimental import pallas as pl
from jax.experimental.pallas import tpu as pltpu


# --------------------------------------------------------------------------
# Kernel 1: attention vector for the whole batch (runs once, tiny).
#   alt_ref : (B, C_in)
#   w1t_ref : (C_in, C_mid)   -- pre-transposed conv1 weight
#   w2t_ref : (C_mid, C_out)  -- pre-transposed conv2 weight
#   att_ref : (B, C_out)      -- sigmoid attention, f32
# --------------------------------------------------------------------------
def _att_kernel(alt_ref, w1t_ref, w2t_ref, att_ref):
    alt = alt_ref[...].astype(jnp.float32)                       # (B, C_in)
    w1t = w1t_ref[...].astype(jnp.float32)                       # (C_in, C_mid)
    w2t = w2t_ref[...].astype(jnp.float32)                       # (C_mid, C_out)

    # 1x1 conv on (B, C_in, 1, 1) == plain matmul with the conv weight.
    h = jnp.dot(alt, w1t, preferred_element_type=jnp.float32)    # (B, C_mid)
    h = jnp.where(h > 0, h, 0.1 * h)                             # LeakyReLU(0.1)
    a = jnp.dot(h, w2t, preferred_element_type=jnp.float32)      # (B, C_out)
    att_ref[...] = 1.0 / (1.0 + jnp.exp(-a))                     # Sigmoid


# --------------------------------------------------------------------------
# Kernel 2: hot loop -- broadcast-multiply one spatial tile of x by att.
#   att_ref : (1, C_out, 1)   f32 (per-batch attention, re-used across tiles)
#   x_ref   : (1, C_out, TW)  native dtype
#   o_ref   : (1, C_out, TW)
# --------------------------------------------------------------------------
def _scale_kernel(att_ref, x_ref, o_ref):
    x = x_ref[...]
    o_ref[...] = (x * att_ref[...].astype(x.dtype)).astype(o_ref.dtype)


def ca_layer_forward(x, altitude, w1, w2):
    """x: (B, C_out, H, W) NCHW ; altitude: (B, C_in) ;
    w1: (C_mid, C_in), w2: (C_out, C_mid) -- PyTorch Conv2d 1x1 weights."""
    B, C_out, H, W = x.shape
    C_in = altitude.shape[1]
    C_mid = w1.shape[0]
    HW = H * W

    # ---- attention vector (tiny, single Pallas call, whole batch) ---------
    w1_t = w1.T  # (C_in, C_mid)   -- transposed once at trace time (free)
    w2_t = w2.T  # (C_mid, C_out)
    att2d = pl.pallas_call(
        _att_kernel,
        out_shape=jax.ShapeDtypeStruct((B, C_out), jnp.float32),
        grid=(1,),
        in_specs=[
            pl.BlockSpec((B, C_in), lambda i: (0, 0)),
            pl.BlockSpec((C_in, C_mid), lambda i: (0, 0)),
            pl.BlockSpec((C_mid, C_out), lambda i: (0, 0)),
        ],
        out_specs=pl.BlockSpec((B, C_out), lambda i: (0, 0)),
    )(altitude, w1_t, w2_t)
    att = att2d[:, :, None]  # (B, C_out, 1) -- plain XLA reshape, outside kernel

    # ---- spatial tiling for the broadcast-multiply -------------------------
    LANE = 128
    itemsize = jnp.dtype(x.dtype).itemsize
    hw_pad = pl.cdiv(HW, LANE) * LANE
    # VMEM budget: 2 double-buffered copies each of the x tile and out tile
    # (4 * C_out * TW * itemsize) must stay well under the default scoped
    # VMEM limit on every generation (16 MiB on v5e, 32 MiB on v6e/v7x).
    budget_bytes = 8 * 1024 * 1024
    max_tw = max(LANE, (budget_bytes // (4 * C_out * itemsize)) // LANE * LANE)
    tw = min(2048, hw_pad, max_tw)
    hw_pad = pl.cdiv(hw_pad, tw) * tw
    n_tiles = hw_pad // tw

    x_flat = x.reshape(B, C_out, HW)
    if hw_pad != HW:
        # Pad spatial axis so every store is a full, unmasked lane-dense vst.
        x_flat = jnp.pad(x_flat, ((0, 0), (0, 0), (0, hw_pad - HW)))

    out_flat = pl.pallas_call(
        _scale_kernel,
        out_shape=jax.ShapeDtypeStruct((B, C_out, hw_pad), x.dtype),
        grid=(B, n_tiles),
        in_specs=[
            pl.BlockSpec((1, C_out, 1), lambda b, t: (b, 0, 0)),   # att (tiny)
            pl.BlockSpec((1, C_out, tw), lambda b, t: (b, 0, t)),  # x tile
        ],
        out_specs=pl.BlockSpec((1, C_out, tw), lambda b, t: (b, 0, t)),
        compiler_params=pltpu.CompilerParams(
            dimension_semantics=("parallel", "parallel")),
    )(att, x_flat)

    if hw_pad != HW:
        out_flat = out_flat[:, :, :HW]
    return out_flat.reshape(B, C_out, H, W)


def _reference(x, altitude, w1, w2):
    # Pure-JAX reference of the PyTorch forward.
    h = altitude @ w1.T
    h = jnp.where(h > 0, h, 0.1 * h)
    att = jax.nn.sigmoid(h @ w2.T)            # (B, C_out)
    return x * att[:, :, None, None]


if __name__ == "__main__":
    # Module hyperparameters (synthetic, deterministic).
    channels_in, channels_out, reduction = 4, 4, 2
    c_mid = channels_in // reduction
    B, H, W = 2, 16, 16

    key = jax.random.PRNGKey(0)
    kx, ka, k1, k2 = jax.random.split(key, 4)

    x = jax.random.normal(kx, (B, channels_out, H, W), dtype=jnp.float32)
    altitude = jax.random.normal(ka, (B, channels_in), dtype=jnp.float32)
    # Deterministic "kaiming-ish" init for the two 1x1 conv weights (no bias).
    w1 = jax.random.normal(k1, (c_mid, channels_in), dtype=jnp.float32) * (
        1.0 / jnp.sqrt(channels_in))
    w2 = jax.random.normal(k2, (channels_out, c_mid), dtype=jnp.float32) * (
        1.0 / jnp.sqrt(c_mid))

    out = ca_layer_forward(x, altitude, w1, w2)
    out = jax.block_until_ready(out)

    ref = _reference(x, altitude, w1, w2)
    assert out.shape == (B, channels_out, H, W)
    assert jnp.allclose(out, ref, atol=1e-5, rtol=1e-5), "mismatch vs reference"

    print("KERNEL_OK")
</pallas_src>

<mosaic_0001>
module attributes {stable_mosaic.version = 11 : i64} {
  func.func @_att_kernel(%arg0: i32, %arg1: memref<2x4xf32, #tpu.memory_space<vmem>>, %arg2: memref<4x2xf32, #tpu.memory_space<vmem>>, %arg3: memref<2x4xf32, #tpu.memory_space<vmem>>, %arg4: memref<2x4xf32, #tpu.memory_space<vmem>>) attributes {dimension_semantics = [#tpu.dimension_semantics<arbitrary>], iteration_bounds = array<i64: 1>, scalar_prefetch = 0 : i64, scratch_operands = 0 : i64, tpu.core_type = #tpu.core_type<tc>, window_params = [{pipeline_mode = #tpu.pipeline_mode<synchronous>, transform_indices = @transform_0, window_bounds = array<i64: 2, 4>}, {pipeline_mode = #tpu.pipeline_mode<synchronous>, transform_indices = @transform_1, window_bounds = array<i64: 4, 2>}, {pipeline_mode = #tpu.pipeline_mode<synchronous>, transform_indices = @transform_2, window_bounds = array<i64: 2, 4>}, {pipeline_mode = #tpu.pipeline_mode<synchronous>, transform_indices = @transform_3, window_bounds = array<i64: 2, 4>}]} {
    %c0 = arith.constant 0 : index
    %c0_0 = arith.constant 0 : index
    %0 = vector.load %arg1[%c0, %c0_0] : memref<2x4xf32, #tpu.memory_space<vmem>>, vector<2x4xf32>
    %c0_1 = arith.constant 0 : index
    %c0_2 = arith.constant 0 : index
    %1 = vector.load %arg2[%c0_1, %c0_2] : memref<4x2xf32, #tpu.memory_space<vmem>>, vector<4x2xf32>
    %c0_3 = arith.constant 0 : index
    %c0_4 = arith.constant 0 : index
    %2 = vector.load %arg3[%c0_3, %c0_4] : memref<2x4xf32, #tpu.memory_space<vmem>>, vector<2x4xf32>
    %cst = arith.constant dense<0.000000e+00> : vector<2x2xf32>
    %3 = tpu.matmul %0, %1, %cst {dimension_numbers = #tpu.dot_dimension_numbers<[1], [0], [0], [1], [0, 0, 1, 1], [], []>} : vector<2x4xf32>, vector<4x2xf32>, vector<2x2xf32> -> vector<2x2xf32>
    %cst_5 = arith.constant 0.000000e+00 : f32
    %4 = vector.broadcast %cst_5 : f32 to vector<2x2xf32>
    %5 = arith.cmpf ogt, %3, %4 : vector<2x2xf32>
    %cst_6 = arith.constant 1.000000e-01 : f32
    %6 = vector.broadcast %cst_6 : f32 to vector<2x2xf32>
    %7 = arith.mulf %6, %3 : vector<2x2xf32>
    %8 = arith.select %5, %3, %7 : vector<2x2xi1>, vector<2x2xf32>
    %cst_7 = arith.constant dense<0.000000e+00> : vector<2x4xf32>
    %9 = tpu.matmul %8, %2, %cst_7 {dimension_numbers = #tpu.dot_dimension_numbers<[1], [0], [0], [1], [0, 0, 1, 1], [], []>} : vector<2x2xf32>, vector<2x4xf32>, vector<2x4xf32> -> vector<2x4xf32>
    %cst_8 = arith.constant 0.000000e+00 : f32
    %10 = vector.broadcast %cst_8 : f32 to vector<2x4xf32>
    %11 = arith.subf %10, %9 : vector<2x4xf32>
    %12 = math.exp %11 : vector<2x4xf32>
    %cst_9 = arith.constant 1.000000e+00 : f32
    %13 = vector.broadcast %cst_9 : f32 to vector<2x4xf32>
    %14 = arith.addf %13, %12 : vector<2x4xf32>
    %cst_10 = arith.constant 1.000000e+00 : f32
    %15 = vector.broadcast %cst_10 : f32 to vector<2x4xf32>
    %16 = arith.divf %15, %14 : vector<2x4xf32>
    %c0_11 = arith.constant 0 : index
    %c0_12 = arith.constant 0 : index
    %17 = vector.load %arg4[%c0_11, %c0_12] : memref<2x4xf32, #tpu.memory_space<vmem>>, vector<2x4xf32>
    tpu.vector_store %arg4[%c0_11, %c0_12], %16 {strides = array<i32>} : memref<2x4xf32, #tpu.memory_space<vmem>>, vector<2x4xf32>,
    return
  }
  func.func @transform_0(%arg0: i32) -> (i32, i32) {
    %c0_i32 = arith.constant 0 : i32
    %c0_i32_0 = arith.constant 0 : i32
    %c0_i32_1 = arith.constant 0 : i32
    return %c0_i32, %c0_i32_0 : i32, i32
  }
  func.func @transform_1(%arg0: i32) -> (i32, i32) {
    %c0_i32 = arith.constant 0 : i32
    %c0_i32_0 = arith.constant 0 : i32
    %c0_i32_1 = arith.constant 0 : i32
    return %c0_i32, %c0_i32_0 : i32, i32
  }
  func.func @transform_2(%arg0: i32) -> (i32, i32) {
    %c0_i32 = arith.constant 0 : i32
    %c0_i32_0 = arith.constant 0 : i32
    %c0_i32_1 = arith.constant 0 : i32
    return %c0_i32, %c0_i32_0 : i32, i32
  }
  func.func @transform_3(%arg0: i32) -> (i32, i32) {
    %c0_i32 = arith.constant 0 : i32
    %c0_i32_0 = arith.constant 0 : i32
    %c0_i32_1 = arith.constant 0 : i32
    return %c0_i32, %c0_i32_0 : i32, i32
  }
}

</mosaic_0001>

<bundles_post_ra>
// kernel: tpu_custom_call.1
= control target key start
LH: loop header
LB: loop body
LE: loop exit
PB: predicated region body
PF: predicated region fallthrough
CT: control target
= control target key end

     0   :  { %vm22_vm0 = vcmask 1043456   ;;  %vm18_vm1 = vcmask 31744   ;;  %v246_v1 = vmov 0.0   ;;  %vm247_vm2 = vmmov 0   ;;  %s281_s0 = inlined_call_operand.vmem [shape: f32[2,4], index: 0, kind: input, shape index: {}]   ;;  %s282_s1 = inlined_call_operand.vmem [shape: f32[4,2], index: 1, kind: input, shape index: {}]   ;;  %s283_s2 = inlined_call_operand.vmem [shape: f32[2,4], index: 2, kind: input, shape index: {}]   ;;  %s284_s3 = inlined_call_operand.hbm [shape: f32[2,4], index: 3, kind: output, shape index: {}]  }
   0x1   :  { %v16_v0 = vld [vmem:[%s282_s1] sm:$0xf]  ;;  %207 = vmatprep.subr.mxu0 %v246_v1  ;;  %209 = vmatprep.mubr.msk.f32.mxu0 %vm247_vm2, %v246_v1 }
   0x2   :  { %v15_v2 = vld [vmem:[%s281_s0] sm:$0x3] }
   0x3   :  { %8 = vsyncpa [#allocation3], 0  ;;  %208 = vmatpush3.msk.msra.mxu0 %vm22_vm0, %v16_v0  ;;  %212 = vmatprep.subr.mxu1 %v246_v1  ;;  %v17_v3 = vld [vmem:[%s283_s2] sm:$0x3]  ;;  %vm103_vm3 = vcmask 1041408   ;;  %vm99_vm5 = vcmask 15360  }
   0x4   :  { %210 = vmatmul.mubr.msk.f32.vlgmr.msra.gmra.mxu0 %vm18_vm1, %v15_v2  ;;  %214 = vmatprep.mubr.msk.f32.mxu1 %vm247_vm2, %v246_v1  ;;  %s248_s0 = smov [#allocation2]   ;;  %vm183_vm6 = vcmask 25600  }
   0x5   :  { %213 = vmatpush3.msk.msra.mxu1 %vm103_vm3, %v17_v3  ;;  %s191_s1 = sshll.u32 %s248_s0, 4  ;;  %s192_s1 = int_to_ptr.vmem [resolvable:$true] %s191_s1 }
   0x6   :  { %s224_s2 = scalar_lea.vmem %s192_s1, 32  ;;  %p229_p1 = scmp.lt.s32.totalorder %s192_s1, %s192_s1 }
   0x7   :  { %p225_p0 = scmp.ne.s32.totalorder %s192_s1, %s224_s2  ;;  %p230_p2 = scmp.lt.s32.totalorder %s224_s2, %s224_s2 }
   0x9   :  { %p231_p3 = por %p230_p2, %p229_p1 }
   0xb   :  { %p232_p4 = pnand %p231_p3, %p225_p0 }
  0xc4   :  { %v92_v4 = vpop.f32.mrf.mxu0 }
  0xc5   :  { %vm96_vm4 = vcmp.gt.f32.partialorder %v92_v4, 0.0  ;;  %v97_v5 = vmul.f32 0.1, %v92_v4 }
  0xc6   :  { %v211_v6 = vpop.f32.mrf.mxu0 }
  0xc7   :  { %v98_v7 = vsel %vm96_vm4, %v92_v4, %v97_v5 }
  0xc8   :  { %215 = vmatmul.mubr.msk.f32.vlgmr.msra.gmra.mxu1 %vm99_vm5, %v98_v7 }
 0x188   :  { %v173_v8 = vpop.f32.mrf.mxu1 }
 0x189   :  { %v177_v9 = vsub.f32 0.0, %v173_v8 }
 0x18a   :  { %v216_v10 = vpop.f32.mrf.mxu1 }
 0x18b   :  { %v178_v11 = vmul.f32 1.442695, %v177_v9 }
 0x18d   :  { %220 = vpow2.f32 %v178_v11 }
 0x19a   :  { %v221_v12 = vpop.eup %220 }
 0x19b   :  { %v180_v13 = vadd.f32 1.0, %v221_v12 }
 0x19d   :  { %222 = vrcp.f32 %v180_v13 }
 0x1aa   :  { %v223_v14 = vpop.eup %222 }
 0x1ab   :  { %184 = vst.msk [vmem:[#allocation2] sm:$0x3] %vm183_vm6, %v223_v14 }
 0x1ac   :  { %235 = shalt.err (!%p232_p4)
}
 0x1ad   :  { %194 = dma.vmem_to_hbm [thread:$0]  %s192_s1, 32, %s284_s3, [#allocation3]  }
 0x1ae   :  { %244 = dma.done.wait [#allocation3], 32  }
 0x1af   :  { %245 = vsyncadd [#allocation3], 4294967264 }
 0x1b0   :  { %198 = vsyncpa [#allocation3], 1 }

</bundles_post_ra>
